<compile_context>
chip_gen: v6e
topology: v6e:2x2x1
jax: 0.10.0
libtpu: 0.0.40
codegen_flags: <defaults>
</compile_context>

<pallas_src>
import functools

import jax
import jax.numpy as jnp
from jax import lax
from jax.experimental import pallas as pl
from jax.experimental.pallas import tpu as pltpu

EPS = 1e-5
VMEM_LIMIT = 48 * 1024 * 1024   # safe on v5e/v6e (128 MiB) and v7x (64 MiB)


def _stats_kernel(tm, n_rows, need_mask,
                  x_ref, w1_ref, sc1_ref, sh1_ref, w2_ref, stat_ref):
    """Per row-tile: layer1 (folded BN1+ReLU) -> layer2 -> partial h2 moments."""
    h1 = jnp.dot(x_ref[...], w1_ref[...], preferred_element_type=jnp.float32)
    a1 = jnp.maximum(h1 * sc1_ref[...] + sh1_ref[...], 0.0)
    if need_mask:                       # zero padded rows out of the BN2 sums
        row = (pl.program_id(1) * tm
               + lax.broadcasted_iota(jnp.int32, a1.shape, 0))
        a1 = jnp.where(row < n_rows, a1, 0.0)
    h2 = jnp.dot(a1.astype(jnp.bfloat16), w2_ref[...],
                 preferred_element_type=jnp.float32)
    s = jnp.sum(h2, axis=0, keepdims=True)           # (1, C2)
    sq = jnp.sum(h2 * h2, axis=0, keepdims=True)     # (1, C2)
    stat_ref[...] = jnp.concatenate([s, sq], axis=0).reshape(stat_ref.shape)


def _final_kernel(tm, n_rows, need_mask,
                  x_ref, w1_ref, sc1_ref, sh1_ref, w2_ref,
                  sc2_ref, sh2_ref, o_ref):
    """Per row-tile: both layers with folded BN + ReLU, per-batch running max."""
    j = pl.program_id(1)
    h1 = jnp.dot(x_ref[...], w1_ref[...], preferred_element_type=jnp.float32)
    a1 = jnp.maximum(h1 * sc1_ref[...] + sh1_ref[...], 0.0)
    h2 = jnp.dot(a1.astype(jnp.bfloat16), w2_ref[...],
                 preferred_element_type=jnp.float32)
    a2 = jnp.maximum(h2 * sc2_ref[...] + sh2_ref[...], 0.0)
    if need_mask:                       # ReLU output >= 0, so 0 never wins the max
        row = j * tm + lax.broadcasted_iota(jnp.int32, a2.shape, 0)
        a2 = jnp.where(row < n_rows, a2, 0.0)
    tile_max = jnp.max(a2, axis=0, keepdims=True)    # (1, C2)

    @pl.when(j == 0)
    def _():
        o_ref[...] = tile_max.reshape(o_ref.shape)

    @pl.when(j > 0)
    def _():
        o_ref[...] = jnp.maximum(o_ref[...], tile_max.reshape(o_ref.shape))


def _pick_tile_rows(n, cap=2048):
    """Largest multiple-of-16 row tile <= cap with small per-batch padding."""
    cap = max(16, min(cap, -(-n // 16) * 16))
    allowed_pad = max(n // 16, 16)      # allow ~6% padding (or 16 rows if tiny)
    best = 16
    for t in range(16, cap + 1, 16):
        pad = -(-n // t) * t - n
        if pad <= allowed_pad:
            best = t
    return best


def res_name_feature_transform_net(x, params):
    """x: (B, N, 25) float32  ->  (B, 256) float32."""
    B, N, K = x.shape
    w1t, g1, be1, w2t, g2, be2 = params     # conv biases omitted (dead under BN)
    C1, C2 = w1t.shape[1], w2t.shape[1]
    assert C2 % 128 == 0, "C2 must be lane-aligned"
    n = B * N

    # ---- pad layer-1 channels to a lane-dense multiple of 128 (see header) ----
    C1P = -(-C1 // 128) * 128
    w1p = jnp.zeros((K, C1P), jnp.bfloat16).at[:, :C1].set(w1t.astype(jnp.bfloat16))
    w2p = jnp.zeros((C1P, C2), jnp.bfloat16).at[:C1, :].set(w2t.astype(jnp.bfloat16))
    g1p = jnp.zeros((1, C1P), jnp.float32).at[:, :C1].set(g1.astype(jnp.float32))
    be1p = jnp.zeros((1, C1P), jnp.float32).at[:, :C1].set(be1.astype(jnp.float32))
    g2f = g2.astype(jnp.float32)
    be2f = be2.astype(jnp.float32)

    # bf16 x matches the kernel's MXU operands; also used for the analytic stats.
    xb = x.reshape(n, K).astype(jnp.bfloat16)
    xf = xb.astype(jnp.float32)
    w1f = w1p.astype(jnp.float32)

    # ---- analytic BN1 (training-mode batch stats), folded to scale1/shift1 ----
    hi = lax.Precision.HIGHEST
    mu1 = jnp.dot(jnp.sum(xf, axis=0, keepdims=True) / n, w1f, precision=hi)
    m2 = jnp.dot(xf.T, xf, precision=hi) / n                       # (K, K)
    ex2 = jnp.sum(jnp.dot(m2, w1f, precision=hi) * w1f, axis=0, keepdims=True)
    var1 = jnp.maximum(ex2 - mu1 * mu1, 0.0)
    scale1 = g1p * lax.rsqrt(var1 + EPS)        # padded channels: 0
    shift1 = be1p - mu1 * scale1                # padded channels: 0

    # ---- row tiling (pad ragged N per batch, mask inside the kernel) ----
    tm = _pick_tile_rows(N)
    J = -(-N // tm)
    N_pad = J * tm
    need_mask = (N_pad != N)
    if need_mask:
        x2 = (jnp.zeros((B, N_pad, K), jnp.bfloat16)
              .at[:, :N, :].set(xb.reshape(B, N, K))
              .reshape(B * N_pad, K))
    else:
        x2 = xb

    row_idx = lambda b, j: (b * J + j, 0)
    const2 = lambda b, j: (0, 0)

    flops_sweep = 2 * B * N_pad * (K * C1P + C1P * C2)
    w_bytes = (w1p.size + w2p.size) * 2 + (2 * C1P + 2 * C2) * 4

    # ---- call 1: per-tile partial BN2 moments (fully parallel grid) ----
    partial_stats = pl.pallas_call(
        functools.partial(_stats_kernel, tm, N, need_mask),
        out_shape=jax.ShapeDtypeStruct((B * J, 2, C2), jnp.float32),
        grid=(B, J),
        in_specs=[
            pl.BlockSpec((tm, K), row_idx),       # x row tile (pipelined)
            pl.BlockSpec((K, C1P), const2),       # w1 (resident)
            pl.BlockSpec((1, C1P), const2),       # scale1 (folded BN1)
            pl.BlockSpec((1, C1P), const2),       # shift1
            pl.BlockSpec((C1P, C2), const2),      # w2 (resident)
        ],
        out_specs=pl.BlockSpec((1, 2, C2), lambda b, j: (b * J + j, 0, 0)),
        compiler_params=pltpu.CompilerParams(
            dimension_semantics=("parallel", "parallel"),
            vmem_limit_bytes=VMEM_LIMIT),
        cost_estimate=pl.CostEstimate(
            flops=flops_sweep, transcendentals=0,
            bytes_accessed=x2.size * 2 + w_bytes + B * J * 2 * C2 * 4),
    )(x2, w1p, scale1, shift1, w2p)

    # ---- reduce partials, fold BN2 into scale2/shift2 (cheap JAX) ----
    sum2 = jnp.sum(partial_stats[:, 0, :], axis=0, keepdims=True)
    sq2 = jnp.sum(partial_stats[:, 1, :], axis=0, keepdims=True)
    mu2 = sum2 / n
    var2 = jnp.maximum(sq2 / n - mu2 * mu2, 0.0)
    scale2 = g2f * lax.rsqrt(var2 + EPS)
    shift2 = be2f - mu2 * scale2

    # ---- call 2: finalize — folded BN2 + ReLU + per-batch max ----
    out3 = pl.pallas_call(
        functools.partial(_final_kernel, tm, N, need_mask),
        out_shape=jax.ShapeDtypeStruct((B, 1, C2), jnp.float32),
        grid=(B, J),
        in_specs=[
            pl.BlockSpec((tm, K), row_idx),       # x row tile (pipelined)
            pl.BlockSpec((K, C1P), const2),       # w1
            pl.BlockSpec((1, C1P), const2),       # scale1
            pl.BlockSpec((1, C1P), const2),       # shift1
            pl.BlockSpec((C1P, C2), const2),      # w2
            pl.BlockSpec((1, C2), const2),        # scale2 (folded BN2)
            pl.BlockSpec((1, C2), const2),        # shift2
        ],
        out_specs=pl.BlockSpec((1, 1, C2), lambda b, j: (b, 0, 0)),
        compiler_params=pltpu.CompilerParams(
            dimension_semantics=("parallel", "arbitrary"),
            vmem_limit_bytes=VMEM_LIMIT),
        cost_estimate=pl.CostEstimate(
            flops=flops_sweep, transcendentals=0,
            bytes_accessed=x2.size * 2 + w_bytes + 2 * C2 * 4 + B * C2 * 4),
    )(x2, w1p, scale1, shift1, w2p, scale2, shift2)

    return out3.reshape(B, C2)


def init_params(key, k=25, c1=64, c2=256):
    ks = jax.random.split(key, 6)
    # Conv1d weights are (C_out, C_in, 1) in PyTorch; stored pre-transposed
    # (C_in, C_out) so the kernel does a plain row-major matmul.  Conv biases
    # are omitted: training-mode BN subtracts the batch mean immediately after
    # the conv, so a per-channel bias cancels exactly.
    w1 = 0.1 * jax.random.normal(ks[0], (c1, k), jnp.float32)
    g1 = 1.0 + 0.1 * jax.random.normal(ks[1], (1, c1), jnp.float32)
    be1 = 0.1 * jax.random.normal(ks[2], (1, c1), jnp.float32)
    w2 = 0.1 * jax.random.normal(ks[3], (c2, c1), jnp.float32)
    g2 = 1.0 + 0.1 * jax.random.normal(ks[4], (1, c2), jnp.float32)
    be2 = 0.1 * jax.random.normal(ks[5], (1, c2), jnp.float32)
    return (w1.T, g1, be1, w2.T, g2, be2)


def reference(x, params):
    """Pure-JAX reference of the same forward pass.  Matmul operands are rounded
    to bf16 to mirror the kernel's MXU input precision; BN/ReLU/max stay f32."""
    w1t, g1, be1, w2t, g2, be2 = params
    B, N, K = x.shape
    xb = x.reshape(B * N, K).astype(jnp.bfloat16)
    h = jnp.dot(xb, w1t.astype(jnp.bfloat16), preferred_element_type=jnp.float32)
    mu = h.mean(0, keepdims=True)
    var = ((h - mu) ** 2).mean(0, keepdims=True)
    h = jnp.maximum((h - mu) * lax.rsqrt(var + EPS) * g1 + be1, 0.0)
    h = jnp.dot(h.astype(jnp.bfloat16), w2t.astype(jnp.bfloat16),
                preferred_element_type=jnp.float32)
    mu = h.mean(0, keepdims=True)
    var = ((h - mu) ** 2).mean(0, keepdims=True)
    h = jnp.maximum((h - mu) * lax.rsqrt(var + EPS) * g2 + be2, 0.0)
    return jnp.max(h.reshape(B, N, -1), axis=1)


if __name__ == "__main__":
    key = jax.random.PRNGKey(0)
    k_x, k_p = jax.random.split(key)

    B, N, K = 2, 16, 25      # batch, num points, residue-name feature dim (k=25)
    x = jax.random.normal(k_x, (B, N, K), jnp.float32)
    params = init_params(k_p, k=K)

    out = jax.block_until_ready(res_name_feature_transform_net(x, params))
    ref = jax.block_until_ready(reference(x, params))

    assert out.shape == (B, 256), out.shape
    # Tolerance covers bf16 MXU operands, analytic-vs-empirical BN1 stats and
    # one-pass variance vs the reference's two-pass variance.
    assert jnp.allclose(out, ref, atol=5e-3, rtol=5e-3), \
        float(jnp.max(jnp.abs(out - ref)))

    print("KERNEL_OK")
</pallas_src>

<mosaic_0001>
module attributes {stable_mosaic.version = 11 : i64} {
  func.func @_stats_kernel(%arg0: i32, %arg1: i32, %arg2: memref<16x25xbf16, #tpu.memory_space<vmem>>, %arg3: memref<25x128xbf16, #tpu.memory_space<vmem>>, %arg4: memref<1x128xf32, #tpu.memory_space<vmem>>, %arg5: memref<1x128xf32, #tpu.memory_space<vmem>>, %arg6: memref<128x256xbf16, #tpu.memory_space<vmem>>, %arg7: memref<1x2x256xf32, #tpu.memory_space<vmem>>) attributes {dimension_semantics = [#tpu.dimension_semantics<parallel>, #tpu.dimension_semantics<parallel>], iteration_bounds = array<i64: 2, 1>, scalar_prefetch = 0 : i64, scratch_operands = 0 : i64, tpu.core_type = #tpu.core_type<tc>, window_params = [{transform_indices = @transform_0, window_bounds = array<i64: 16, 25>}, {pipeline_mode = #tpu.pipeline_mode<synchronous>, transform_indices = @transform_1, window_bounds = array<i64: 25, 128>}, {pipeline_mode = #tpu.pipeline_mode<synchronous>, transform_indices = @transform_2, window_bounds = array<i64: 1, 128>}, {pipeline_mode = #tpu.pipeline_mode<synchronous>, transform_indices = @transform_3, window_bounds = array<i64: 1, 128>}, {pipeline_mode = #tpu.pipeline_mode<synchronous>, transform_indices = @transform_4, window_bounds = array<i64: 128, 256>}, {transform_indices = @transform_5, window_bounds = array<i64: 1, 2, 256>}]} {
    %c0 = arith.constant 0 : index
    %c0_0 = arith.constant 0 : index
    %0 = vector.load %arg2[%c0, %c0_0] : memref<16x25xbf16, #tpu.memory_space<vmem>>, vector<16x25xbf16>
    %c0_1 = arith.constant 0 : index
    %c0_2 = arith.constant 0 : index
    %1 = vector.load %arg3[%c0_1, %c0_2] : memref<25x128xbf16, #tpu.memory_space<vmem>>, vector<25x128xbf16>
    %cst = arith.constant dense<0.000000e+00> : vector<16x128xf32>
    %2 = tpu.matmul %0, %1, %cst {dimension_numbers = #tpu.dot_dimension_numbers<[1], [0], [0], [1], [0, 0, 1, 1], [], []>} : vector<16x25xbf16>, vector<25x128xbf16>, vector<16x128xf32> -> vector<16x128xf32>
    %c0_3 = arith.constant 0 : index
    %c0_4 = arith.constant 0 : index
    %3 = vector.load %arg4[%c0_3, %c0_4] : memref<1x128xf32, #tpu.memory_space<vmem>>, vector<1x128xf32>
    %4 = vector.broadcast %3 : vector<1x128xf32> to vector<16x128xf32>
    %5 = arith.mulf %2, %4 : vector<16x128xf32>
    %c0_5 = arith.constant 0 : index
    %c0_6 = arith.constant 0 : index
    %6 = vector.load %arg5[%c0_5, %c0_6] : memref<1x128xf32, #tpu.memory_space<vmem>>, vector<1x128xf32>
    %7 = vector.broadcast %6 : vector<1x128xf32> to vector<16x128xf32>
    %8 = arith.addf %5, %7 : vector<16x128xf32>
    %cst_7 = arith.constant 0.000000e+00 : f32
    %9 = vector.broadcast %cst_7 : f32 to vector<16x128xf32>
    %10 = arith.maximumf %8, %9 : vector<16x128xf32>
    %11 = arith.truncf %10 : vector<16x128xf32> to vector<16x128xbf16>
    %c0_8 = arith.constant 0 : index
    %c0_9 = arith.constant 0 : index
    %12 = vector.load %arg6[%c0_8, %c0_9] : memref<128x256xbf16, #tpu.memory_space<vmem>>, vector<128x256xbf16>
    %cst_10 = arith.constant dense<0.000000e+00> : vector<16x256xf32>
    %13 = tpu.matmul %11, %12, %cst_10 {dimension_numbers = #tpu.dot_dimension_numbers<[1], [0], [0], [1], [0, 0, 1, 1], [], []>} : vector<16x128xbf16>, vector<128x256xbf16>, vector<16x256xf32> -> vector<16x256xf32>
    %cst_11 = arith.constant dense<0.000000e+00> : vector<256xf32>
    %14 = vector.multi_reduction <add>, %13, %cst_11 [0] : vector<16x256xf32> to vector<256xf32>
    %15 = vector.shape_cast %14 : vector<256xf32> to vector<1x256xf32>
    %16 = arith.mulf %13, %13 : vector<16x256xf32>
    %cst_12 = arith.constant dense<0.000000e+00> : vector<256xf32>
    %17 = vector.multi_reduction <add>, %16, %cst_12 [0] : vector<16x256xf32> to vector<256xf32>
    %18 = vector.shape_cast %17 : vector<256xf32> to vector<1x256xf32>
    %19 = tpu.concatenate %15, %18 in 0 : vector<1x256xf32>, vector<1x256xf32> -> vector<2x256xf32>
    %20 = vector.shape_cast %19 : vector<2x256xf32> to vector<1x2x256xf32>
    %c0_13 = arith.constant 0 : index
    %c0_14 = arith.constant 0 : index
    %c0_15 = arith.constant 0 : index
    %21 = vector.load %arg7[%c0_13, %c0_14, %c0_15] : memref<1x2x256xf32, #tpu.memory_space<vmem>>, vector<1x2x256xf32>
    tpu.vector_store %arg7[%c0_13, %c0_14, %c0_15], %20 {strides = array<i32>} : memref<1x2x256xf32, #tpu.memory_space<vmem>>, vector<1x2x256xf32>,
    return
  }
  func.func @transform_0(%arg0: i32, %arg1: i32) -> (i32, i32) {
    %c1_i32 = arith.constant 1 : i32
    %0 = arith.muli %arg0, %c1_i32 : i32
    %1 = arith.addi %0, %arg1 : i32
    %c0_i32 = arith.constant 0 : i32
    %c0_i32_0 = arith.constant 0 : i32
    return %1, %c0_i32 : i32, i32
  }
  func.func @transform_1(%arg0: i32, %arg1: i32) -> (i32, i32) {
    %c0_i32 = arith.constant 0 : i32
    %c0_i32_0 = arith.constant 0 : i32
    %c0_i32_1 = arith.constant 0 : i32
    return %c0_i32, %c0_i32_0 : i32, i32
  }
  func.func @transform_2(%arg0: i32, %arg1: i32) -> (i32, i32) {
    %c0_i32 = arith.constant 0 : i32
    %c0_i32_0 = arith.constant 0 : i32
    %c0_i32_1 = arith.constant 0 : i32
    return %c0_i32, %c0_i32_0 : i32, i32
  }
  func.func @transform_3(%arg0: i32, %arg1: i32) -> (i32, i32) {
    %c0_i32 = arith.constant 0 : i32
    %c0_i32_0 = arith.constant 0 : i32
    %c0_i32_1 = arith.constant 0 : i32
    return %c0_i32, %c0_i32_0 : i32, i32
  }
  func.func @transform_4(%arg0: i32, %arg1: i32) -> (i32, i32) {
    %c0_i32 = arith.constant 0 : i32
    %c0_i32_0 = arith.constant 0 : i32
    %c0_i32_1 = arith.constant 0 : i32
    return %c0_i32, %c0_i32_0 : i32, i32
  }
  func.func @transform_5(%arg0: i32, %arg1: i32) -> (i32, i32, i32) {
    %c1_i32 = arith.constant 1 : i32
    %0 = arith.muli %arg0, %c1_i32 : i32
    %1 = arith.addi %0, %arg1 : i32
    %c0_i32 = arith.constant 0 : i32
    %c0_i32_0 = arith.constant 0 : i32
    %c0_i32_1 = arith.constant 0 : i32
    return %1, %c0_i32, %c0_i32_0 : i32, i32, i32
  }
}

</mosaic_0001>

<bundles_post_ra>
// kernel: tpu_custom_call.1
= control target key start
LH: loop header
LB: loop body
LE: loop exit
PB: predicated region body
PF: predicated region fallthrough
CT: control target
= control target key end

     0   :  { %s1257_s0 = inlined_call_operand.hbm [shape: bf16[32,25], index: 0, kind: input, shape index: {}]   ;;  %s1258_s1 = inlined_call_operand.hbm [shape: bf16[25,128], index: 1, kind: input, shape index: {}]   ;;  %s1259_s2 = inlined_call_operand.vmem [shape: f32[1,128], index: 2, kind: input, shape index: {}]   ;;  %s1260_s3 = inlined_call_operand.vmem [shape: f32[1,128], index: 3, kind: input, shape index: {}]   ;;  %s1261_s4 = inlined_call_operand.hbm [shape: bf16[128,256], index: 4, kind: input, shape index: {}]   ;;  %s1262_s5 = inlined_call_operand.hbm [shape: f32[2,2,256], index: 5, kind: output, shape index: {}]  }
   0x1   :  { %1265 = sst [smem:[#allocation12_spill]] %s1258_s1 }
   0x2   :  { %10 = vsyncpa [#allocation3], 0 }
   0x3   :  { %12 = vsyncpa [#allocation3 + $0x1], 0 }
   0x4   :  { %13 = vsyncpa [#allocation6], 0 }
   0x5   :  { %14 = vsyncpa [#allocation4], 0 }
   0x6   :  { %16 = vsyncpa [#allocation4 + $0x1], 0  ;;  %s1070_s18 = smov 0   ;;  %s1072_s19 = smov 0  }
   0x7   :  { %s1074_s20 = smov 0   ;;  %s1076_s21 = smov 0  }
   0x8   :  { %s1078_s22 = smov 0   ;;  %s1080_s23 = smov 0  }
   0x9 LB: > { %s689_s24 = sadd.s32 4294967295, %s1026_s23   ;;  %s690_s25 = sadd.s32 4294967294, %s1026_s23   ;;  %s1026_s23 = sphi %s1080_s23, %s22_s23   ;;  %s1022_s22 = sphi %s1078_s22, %s1283_s22   ;;  %s1018_s21 = sphi %s1076_s21, %s1282_s21   ;;  %s1014_s20 = sphi %s1074_s20, %s1281_s20   ;;  %s1010_s19 = sphi %s1072_s19, %s1280_s19   ;;  %s1006_s18 = sphi %s1070_s18, %s1279_s18  }
   0xa   : > { %p56_p0 = scmp.ne.s32.totalorder %s1010_s19, %s1006_s18  ;;  %p1104_p1 = scmp.eq.s32.totalorder %s689_s24, 0 }
   0xb   : > { %p1108_p2 = scmp.eq.s32.totalorder %s689_s24, 1  ;;  %p172_p3 = scmp.eq.s32.totalorder %s690_s25, 1 }
   0xc   : > { %p1114_p4 = por %p1104_p1, %p56_p0  ;;  %p691_p5 = scmp.ge.s32.totalorder %s1026_s23, 1 }
   0xd   : > { %p1119_p6 = por %p172_p3, %p56_p0  ;;  %p179_p7 = scmp.lt.s32.totalorder %s1026_s23, 3 }
   0xe   : > { %s1028_s6 = smov [#allocation5]   ;;  %s1029_s9 = smov [#allocation7]  }
   0xf   : > { %s1269_s29 = scalar_select %p1119_p6, 1, 0 }
  0x10   : > { %p1124_p8 = pnand %p691_p5, %p179_p7  ;;  %s191_s7 = sshll.u32 %s1028_s6, 4  ;;  %s192_s7 = int_to_ptr.vmem [resolvable:$true] %s191_s7 }
  0x11   : > { %s210_s10 = sshll.u32 %s1029_s9, 4  ;;  %s873_s11 = scalar_lea.vmem %s192_s7, 256  ;;  %s211_s10 = int_to_ptr.vmem [resolvable:$true] %s210_s10 }
  0x12   : > { %p756_p9 = pneg %p1124_p8  ;;  %p874_p13 = scmp.ne.s32.totalorder %s192_s7, %s873_s11 }
  0x13   : > { %p881_p5 = scmp.lt.s32.totalorder %s192_s7, %s192_s7  ;;  %p882_p7 = scmp.lt.s32.totalorder %s873_s11, %s873_s11 }
  0x14   : > { %p1133_p11 = pnand %p756_p9, %p1104_p1 }
  0x15   : > { %p883_p10 = por %p882_p7, %p881_p5 }
  0x16   : > { %p864_p12 = pneg %p1133_p11 }
  0x18   : > { %p876_p0 = pnand %p874_p13, %p864_p12 }
  0x1a   : > { %p877_p3 = pneg %p876_p0 }
  0x1c   : > { %p884_p9 = pnand %p883_p10, %p877_p3 }
  0x1e   : > { %887 = shalt.err (!%p884_p9)
}
  0x1f   : > { %s1263_s12 = smov 64   ;;  %s1264_s13 = smov 4  }
  0x20   : > { %s1272_s1 = sld [smem:[#allocation12_spill]]  ;;  %s899_s16 = scalar_lea.vmem %s211_s10, 2048 }
  0x21   : > { %p900_p13 = scmp.ne.s32.totalorder %s211_s10, %s899_s16  ;;  %p907_p10 = scmp.lt.s32.totalorder %s211_s10, %s211_s10 }
  0x22   : > { %p908_p3 = scmp.lt.s32.totalorder %s899_s16, %s899_s16 }
  0x23   : > { %p902_p0 = pnand %p900_p13, %p864_p12 }
  0x24   : > { %p909_p7 = por %p908_p3, %p907_p10 }
  0x25   : > { %p903_p5 = pneg %p902_p0 }
  0x26   : > { %759 = dma.hbm_to_vmem [thread:$0]  (!%p1133_p11), %s1272_s1, 256, %s192_s7, [#allocation6], %s1263_s12, %s1263_s12, %s1264_s13  }
  0x27   : > { %p910_p9 = pnand %p909_p7, %p903_p5 }
  0x29   : > { %913 = shalt.err (!%p910_p9)
}
  0x2a   : > { %s1032_s17 = smov 128   ;;  %s1033_s24 = smov 8  }
  0x2b   : > { %762 = dma.hbm_to_vmem [thread:$0]  (!%p1133_p11), %s1261_s4, 2048, %s211_s10, [#allocation6], %s1032_s17, %s1032_s17, %s1033_s24  }
  0x2c   : > { %s34_s7 = sadd.s32 1, %s1022_s22  ;;  %s43_s9 = sadd.s32 1, %s1014_s20 }
  0x2d   : > { %p36_p12 = scmp.ge.s32.totalorder %s34_s7, 2  ;;  %p50_p13 = scmp.ne.s32.totalorder %s1014_s20, %s1010_s19 }
  0x2e   : > { %p51_p0 = scmp.eq.s32.totalorder %s1026_s23, 0  ;;  %p773_p5 = scmp.lt.s32.totalorder %s1026_s23, 2 }
  0x2f   : > { %s1285_s7 = smov (%p36_p12, %s34_s7), 0  ;;  %p1168_p3 = por %p1108_p2, %p50_p13 }
  0x30   : > { %p52_p10 = por %p51_p0, %p50_p13  ;;  %s40_s8 = ssub.s32 %s1022_s22, %s1285_s7 }
  0x31   : > { %s224_s14 = sand.u32 1, %s1014_s20   ;;  %p41_p7 = scmp.eq.s32.totalorder %s40_s8, 0 }
  0x32   : > { %s695_s10 = sshll.u32 %s224_s14, 3  ;;  %s731_s15 = sshll.u32 %s1022_s22, 7 }
  0x33   : > { %s1177_s16 = scalar_select %p41_p7, %s1014_s20, %s43_s9  }
  0x34   : > { %s235_s25 = scalar_lea.hbm %s1257_s0, %s731_s15  ;;  %s228_s6 = scalar_lea.vmem [#allocation2], %s695_s10 }
  0x35   : > { %s236_s12 = sshll.u32 %s228_s6, 4  ;;  %p1184_p11 = pnand %p773_p5, %p52_p10  ;;  %s237_s12 = int_to_ptr.vmem [resolvable:$true] %s236_s12 }
  0x36   : > { %s225_s13 = scalar_lea.sflag [#allocation3], %s224_s14  ;;  %s927_s8 = scalar_lea.vmem %s237_s12, 128 }
  0x37   : > { %p916_p2 = pneg %p1184_p11  ;;  %p928_p9 = scmp.ne.s32.totalorder %s237_s12, %s927_s8 }
  0x38   : > { %s1034_s9 = smov [#allocation2]  }
  0x39   : > { %p930_p12 = pnand %p928_p9, %p916_p2  ;;  %s932_s1 = sshll.u32 %s1034_s9, 4  ;;  %s933_s1 = int_to_ptr.vmem [resolvable:$false] %s932_s1 }
  0x3a   : > { %s934_s15 = scalar_lea.vmem %s933_s1, 256  ;;  %p935_p0 = scmp.lt.s32.totalorder %s237_s12, %s933_s1 }
  0x3b   : > { %p931_p13 = pneg %p930_p12  ;;  %p936_p7 = scmp.lt.s32.totalorder %s934_s15, %s927_s8 }
  0x3d   : > { %p937_p6 = por %p936_p7, %p935_p0 }
  0x3f   : > { %p938_p5 = pnand %p937_p6, %p931_p13 }
  0x41   : > { %941 = shalt.err (!%p938_p5)
}
  0x42   : > { %s1275_s10 = smov 4   ;;  %s1276_s17 = smov 64  }
  0x43   : > { %766 = dma.hbm_to_vmem [thread:$0]  (!%p1184_p11), %s235_s25, 128, %s237_s12, %s225_s13, %s1276_s17, %s1276_s17, %s1275_s10  }
  0x44   : > { %248 = sbr.rel (%p1124_p8) target bundleno = 525 (0x20d), region = 40  ;;  %s1198_s14 = sand.u32 (!%p1124_p8), 1, %s1010_s19  }
  0x45   : > { %s699_s1 = sshll.u32 (!%p1124_p8), %s1198_s14, 3  ;;  %s251_s24 = scalar_lea.sflag (!%p1124_p8), [#allocation3], %s1198_s14 }
  0x46   : > { %s254_s6 = scalar_lea.vmem (!%p1124_p8), [#allocation2], %s699_s1 }
  0x49   : > { %993 = dma.done.wait (%p1114_p4), %s251_s24, 128  }
  0x4a   : > { %995 = vsyncadd (%p1114_p4), %s251_s24, 4294967168 }
  0x4b   : > { %997 = dma.done.wait (%p1104_p1), [#allocation6], 2304  }
  0x4c   : > { %999 = vsyncadd (%p1104_p1), [#allocation6], 4294964992  ;;  %vm319_vm0 = vcmask 1043456   ;;  %v1035_v0 = vmov 0.0   ;;  %vm1036_vm1 = vmmov 0   ;;  %vm320_vm2 = vcmask 1044480  }
  0x4d   : > { %736 = vmatprep.subr.bf16.mxu0 %v1035_v0  ;;  %740 = vmatprep.mubr.msk.bf16.mxu0 %vm1036_vm1, %v1035_v0  ;;  %v1037_v1 = vmov 65535   ;;  %v835_v4 = vld [vmem:[#allocation5 + $0x8] sm:$0x1f]   ;;  %v836_v6 = vld [vmem:[#allocation5] sm:$0xff]   ;;  %v841_v9 = vld [vmem:[#allocation7 + $0x64] ss:$8 sps:$4 sm:$0xff]  }
  0x4e   : > { %v321_v2 = vsel %vm319_vm0, 4294967295, %v1037_v1  ;;  %v838_v7 = vld [vmem:[#allocation7 + $0x74] ss:$8 sps:$4 sm:$0xff]   ;;  %v840_v8 = vld [vmem:[#allocation7 + $0x70] ss:$8 sps:$4 sm:$0xff]   ;;  %v837_v10 = vld [vmem:[%s254_s6] sm:$0xff]  }
  0x4f   : > { %v322_v3 = vsel %vm320_vm2, %v321_v2, 0  ;;  %484 = vmatprep.subr.bf16.mxu1 %v838_v7  ;;  %v843_v11 = vld [vmem:[#allocation7 + $0x60] ss:$8 sps:$4 sm:$0xff]   ;;  %v844_v12 = vld [vmem:[#allocation7 + $0x54] ss:$8 sps:$4 sm:$0xff]   ;;  %vm315_vm3 = vcmask 203776  }
  0x50   : > { %v324_v5 = vand.u32 %v835_v4, %v322_v3  ;;  %485 = vmatpush1.bf16.msra.mxu1 %v840_v8  ;;  %v846_v13 = vld [vmem:[#allocation7 + $0x50] ss:$8 sps:$4 sm:$0xff]   ;;  %v847_v14 = vld [vmem:[#allocation7 + $0x44] ss:$8 sps:$4 sm:$0xff]   ;;  %v849_v15 = vld [vmem:[#allocation7 + $0x40] ss:$8 sps:$4 sm:$0xff]  }
  0x51   : > { %486 = vmatprep.subr.bf16.mxu1 %v841_v9  ;;  %v850_v16 = vld [vmem:[#allocation7 + $0x34] ss:$8 sps:$4 sm:$0xff]   ;;  %v852_v17 = vld [vmem:[#allocation7 + $0x30] ss:$8 sps:$4 sm:$0xff]   ;;  %v853_v18 = vld [vmem:[#allocation7 + $0x24] ss:$8 sps:$4 sm:$0xff]  }
  0x52   : > { %737 = vmatpush3.bf16.msra.mxu0 %v324_v5  ;;  %v855_v19 = vld [vmem:[#allocation7 + $0x20] ss:$8 sps:$4 sm:$0xff]   ;;  %v856_v20 = vld [vmem:[#allocation7 + $0x14] ss:$8 sps:$4 sm:$0xff]   ;;  %v858_v21 = vld [vmem:[#allocation7 + $0x10] ss:$8 sps:$4 sm:$0xff]  }
  0x53   : > { %738 = vmatprep.subr.bf16.mxu0 %v1035_v0  ;;  %v859_v22 = vld [vmem:[#allocation7 + $0x4] ss:$8 sps:$4 sm:$0xff]   ;;  %v861_v23 = vld [vmem:[#allocation7] ss:$8 sps:$4 sm:$0xff]   ;;  %v1038_v24 = vmov 0   ;;  %s702_s13 = sshll.u32 %s1198_s14, 2 }
  0x54   : > { %487 = vmatpush1.bf16.msra.mxu1 %v843_v11  ;;  %516 = vmatprep.mubr.bf16.mxu1 %v1038_v24  ;;  %v707_v25 = vld [vmem:[%s1259_s2] ss:$0 sm:$0xff]  ;;  %vm559_vm4 = vcmask 1040384   ;;  %s732_s25 = sshll.u32 %s1018_s21, 6  ;;  %s288_s27 = scalar_lea.vmem [#allocation8], %s702_s13 }
  0x55   : > { %488 = vmatprep.subr.bf16.mxu1 %v844_v12  ;;  %v708_v28 = vld [vmem:[%s1260_s3] ss:$0 sm:$0xff]  ;;  %s590_s8 = sshll.u32 %s288_s27, 4  ;;  %s588_s10 = scalar_lea.hbm %s1262_s5, %s732_s25  ;;  %s591_s8 = int_to_ptr.vmem [resolvable:$true] %s590_s8 }
  0x56   : > { %739 = vmatpush3.bf16.msra.mxu0 %v836_v6  ;;  %s575_s17 = scalar_lea.sflag [#allocation4], %s1198_s14  ;;  %s942_s1 = scalar_lea.vmem %s591_s8, 64 }
  0x57   : > { %p943_p1 = scmp.ne.s32.totalorder %s591_s8, %s942_s1  ;;  %s1039_s24 = smov [#allocation8]  }
  0x58   : > { %489 = vmatpush1.bf16.msra.mxu1 %v846_v13  ;;  %s946_s6 = sshll.u32 %s1039_s24, 4  ;;  %s947_s6 = int_to_ptr.vmem [resolvable:$false] %s946_s6 }
  0x59   : > { %741 = vmatmul.mubr.msk.bf16.vlgmr.msra.gmra.mxu0 %vm315_vm3, %v837_v10  ;;  %490 = vmatprep.subr.bf16.mxu1 %v847_v14  ;;  %p944_p4 = pnand %p943_p1, %p1168_p3  ;;  %s948_s21 = scalar_lea.vmem %s947_s6, 128 }
  0x5a   : > { %p949_p8 = scmp.lt.s32.totalorder %s591_s8, %s947_s6  ;;  %p950_p10 = scmp.lt.s32.totalorder %s948_s21, %s942_s1 }
  0x5b   : > { %p945_p6 = pneg %p944_p4 }
  0x5c   : > { %491 = vmatpush1.bf16.msra.mxu1 %v849_v15  ;;  %p951_p11 = por %p950_p10, %p949_p8 }
  0x5d   : > { %492 = vmatprep.subr.bf16.mxu1 %v850_v16 }
  0x5e   : > { %p952_p2 = pnand %p951_p11, %p945_p6 }
  0x60   : > { %493 = vmatpush1.bf16.msra.mxu1 %v852_v17 }
  0x61   : > { %494 = vmatprep.subr.bf16.mxu1 %v853_v18 }
  0x64   : > { %495 = vmatpush1.bf16.msra.mxu1 %v855_v19 }
  0x65   : > { %496 = vmatprep.subr.bf16.mxu1 %v856_v20 }
  0x68   : > { %497 = vmatpush1.bf16.msra.mxu1 %v858_v21 }
  0x69   : > { %498 = vmatprep.subr.bf16.mxu1 %v859_v22 }
  0x6c   : > { %499 = vmatpush1.bf16.msra.mxu1 %v861_v23 }
 0x119   : > { %v360_v26 = vpop.f32.mrf.mxu0 }
 0x11a   : > { %v374_v27 = vmul.f32 %v707_v25, %v360_v26 }
 0x11b   : > { %v742_v29 = vpop.f32.mrf.mxu0 }
 0x11c   : > { %v383_v31 = vadd.f32 %v708_v28, %v374_v27 }
 0x11d   : > { %v363_v30 = vpop.f32.mrf.mxu0 }
 0x11e   : > { %v375_v32 = vmul.f32 %v707_v25, %v363_v30  ;;  %v385_v35 = vmax.f32 %v383_v31, 0.0 }
 0x11f   : > { %v743_v33 = vpop.f32.mrf.mxu0 }
 0x120   : > { %v384_v34 = vadd.f32 %v708_v28, %v375_v32 }
 0x122   : > { %v386_v36 = vmax.f32 %v384_v34, 0.0 }
 0x124   : > { %v387_v37 = vpack.c.bf16 %v386_v36, %v385_v35 }
 0x126   : > { %517 = vmatmul.mubr.bf16.vlgmr.msra.gmra.mxu1 %v387_v37 }
 0x1e6   : > { %v518_v38 = vpop.f32.mrf.mxu1 }
 0x1e7   : > { %v541_v41 = vmul.f32 %v518_v38, %v518_v38 }
 0x1e8   : > { %v520_v39 = vpop.f32.mrf.mxu1 }
 0x1e9   : > { %v542_v44 = vmul.f32 %v520_v39, %v520_v39 }
 0x1ea   : > { %v522_v40 = vpop.f32.mrf.mxu1 }
 0x1eb   : > { %v527_v42 = vadd.f32 %v522_v40, %v518_v38  ;;  %v543_v43 = vmul.f32 %v522_v40, %v522_v40 }
 0x1ec   : > { %v524_v45 = vpop.f32.mrf.mxu1 }
 0x1ed   : > { %v528_v46 = vrot.slane %v527_v42, 4  ;;  %v545_v47 = vadd.f32 %v543_v43, %v541_v41  ;;  %v534_v48 = vadd.f32 %v524_v45, %v520_v39  ;;  %v544_v49 = vmul.f32 %v524_v45, %v524_v45 }
 0x1ef   : > { %v529_v50 = vadd.f32 %v528_v46, %v527_v42  ;;  %v546_v51 = vrot.slane %v545_v47, 4  ;;  %v535_v52 = vrot.slane %v534_v48, 4  ;;  %v552_v53 = vadd.f32 %v544_v49, %v542_v44 }
 0x1f1   : > { %v530_v54 = vrot.slane %v529_v50, 2  ;;  %v547_v55 = vadd.f32 %v546_v51, %v545_v47  ;;  %v536_v56 = vadd.f32 %v535_v52, %v534_v48  ;;  %v553_v57 = vrot.slane %v552_v53, 4 }
 0x1f3   : > { %v531_v58 = vadd.f32 %v530_v54, %v529_v50  ;;  %v548_v59 = vrot.slane %v547_v55, 2  ;;  %v537_v60 = vrot.slane %v536_v56, 2  ;;  %v554_v61 = vadd.f32 %v553_v57, %v552_v53 }
 0x1f5   : > { %v549_v62 = vadd.f32 %v548_v59, %v547_v55  ;;  %v538_v63 = vadd.f32 %v537_v60, %v536_v56  ;;  %v555_v0 = vrot.slane %v554_v61, 2  ;;  %v532_v1 = vrot.slane %v531_v58, 1 }
 0x1f7   : > { %v550_v2 = vrot.slane %v549_v62, 1  ;;  %v539_v3 = vrot.slane %v538_v63, 1  ;;  %v556_v4 = vadd.f32 %v555_v0, %v554_v61  ;;  %v533_v7 = vadd.f32 %v532_v1, %v531_v58 }
 0x1f9   : > { %v551_v5 = vadd.f32 %v550_v2, %v549_v62  ;;  %v557_v6 = vrot.slane %v556_v4, 1  ;;  %v540_v8 = vadd.f32 %v539_v3, %v538_v63 }
 0x1fb   : > { %v558_v9 = vadd.f32 %v557_v6, %v556_v4  ;;  %v560_v11 = vsel %vm559_vm4, %v533_v7, %v551_v5 }
 0x1fd   : > { %v561_v10 = vsel %vm559_vm4, %v540_v8, %v558_v9 }
 0x1fe   : > { %v564_v12 = vcombine.low %v560_v11, %v561_v10 }
 0x200   : > { %725 = vst.sshfl [vmem:[%s288_s27] sm:$0x33 pattern:$0x76325410] %v564_v12 }
 0x201   : > { %955 = shalt.err (!%p952_p2)
}
 0x202   : > { %s956_s26 = scalar_lea.hbm %s588_s10, 64  ;;  %s960_s30 = scalar_lea.hbm %s1262_s5, 128 }
 0x203   : > { %p957_p9 = scmp.ne.s32.totalorder %s588_s10, %s956_s26  ;;  %p961_p0 = scmp.lt.s32.totalorder %s588_s10, %s1262_s5 }
 0x204   : > { %p962_p7 = scmp.lt.s32.totalorder %s960_s30, %s956_s26 }
 0x205   : > { %p958_p12 = pnand %p957_p9, %p1168_p3 }
 0x206   : > { %p963_p5 = por %p962_p7, %p961_p0 }
 0x207   : > { %p959_p13 = pneg %p958_p12 }
 0x209   : > { %p964_p1 = pnand %p963_p5, %p959_p13 }
 0x20b   : > { %967 = shalt.err (!%p964_p1)
}
 0x20c   : > { %754 = dma.vmem_to_hbm [thread:$0]  (%p1168_p3), %s591_s8, 64, %s588_s10, %s575_s17  }
 0x20d PF: > { %s602_s25 = sand.u32 1, %s1006_s18   ;;  %p1277_p4 = scmp.ne.s32.totalorder %s1269_s29, 0 }
 0x20e   : > { %p1278_p6 = scmp.ge.s32.totalorder %s1026_s23, 2  ;;  %s603_s27 = scalar_lea.sflag [#allocation4], %s602_s25 }
 0x210   : > { %p768_p8 = pnand %p1278_p6, %p1277_p4 }
 0x212   : > { %p769_p10 = pneg %p768_p8 }
 0x214   : > { %1001 = dma.done.wait (%p769_p10), %s603_s27, 64  }
 0x215   : > { %1003 = vsyncadd (%p769_p10), %s603_s27, 4294967232  ;;  %s22_s23 = sadd.s32 1, %s1026_s23   ;;  %s1279_s18 = smov %s1010_s19 }
 0x216   : > { %p19_p11 = scmp.ge.s32.totalorder %s22_s23, 4   ;;  %s1280_s19 = smov %s1014_s20 }
 0x217   : > { %s1281_s20 = smov %s1177_s16  ;;  %s1282_s21 = smov %s1022_s22 }
 0x218   : > { %s1283_s22 = smov %s1285_s7  ;;  %21 = sbr.rel (!%p19_p11) target bundleno = 9 (0x9), region = 93 }
 0x21d   :  { %608 = vsyncpa [#allocation3], 1 }
 0x21e   :  { %610 = vsyncpa [#allocation3 + $0x1], 1 }
 0x21f   :  { %611 = vsyncpa [#allocation6], 1 }
 0x220   :  { %612 = vsyncpa [#allocation4], 1 }
 0x221   :  { %614 = vsyncpa [#allocation4 + $0x1], 1 }

</bundles_post_ra>
